<compile_context>
chip_gen: v6e
topology: v6e:2x2x1
jax: 0.10.0
libtpu: 0.0.40
codegen_flags: <defaults>
</compile_context>

<pallas_src>
import jax
import jax.numpy as jnp
from jax.experimental import pallas as pl
from jax.experimental.pallas import tpu as pltpu

LANE = 128


def _round_up(v, m):
    return ((v + m - 1) // m) * m


def _pick_tiles(n_pad):
    """Pick (tm, tk) as exact divisors of the 128-rounded N (no over-padding)."""
    divisors = [c for c in (512, 384, 256, 128) if n_pad % c == 0]
    if not divisors:
        return n_pad, n_pad
    tk = divisors[0]              # biggest tile -> closest to HBM roofline
    tm = tk
    multi = [c for c in divisors if n_pad // c >= 2]
    if multi:                     # keep >=2 row tiles so v7x's 2 TCs both work
        tm = multi[0]
    return tm, tk


def _vmem_bytes(tm, tk, c, c_out, out_itemsize, a_buffers=3):
    """Rough per-layer VMEM footprint (double-buffered operands + scratch)."""
    bf16, f32 = 2, 4
    total = a_buffers * tm * tk * bf16          # A tiles
    total += 2 * tk * c * bf16                  # X k-stream
    total += 2 * tm * c * bf16                  # X root rows
    total += 2 * tm * f32                       # deg_inv
    total += 2 * 2 * c * c_out * bf16           # W_l, W_r
    total += 2 * c_out * f32                    # bias
    total += 2 * tm * c_out * out_itemsize      # output tile
    total += tm * c * f32 + tm * c_out * f32    # acc + root scratch
    return total


def _a_block_spec(tm, tk, n_buffers):
    """Adjacency-tile spec; deeper buffering on the HBM-bound A stream when
    requested and supported by the installed Pallas."""
    index_map = lambda i, k: (i, k)
    if n_buffers > 2 and hasattr(pl, "Buffered"):
        try:
            return pl.BlockSpec((tm, tk), index_map,
                                pipeline_mode=pl.Buffered(n_buffers))
        except TypeError:   # older BlockSpec signature without pipeline_mode
            pass
    return pl.BlockSpec((tm, tk), index_map)


def sage_layer_kernel(a_ref, xk_ref, xi_ref, dinv_ref, wl_ref, wr_ref, b_ref,
                      o_ref, acc_ref, root_ref):
    """One SAGEConv layer (+ ReLU) at one (row-tile i, reduction-tile k) step.

    a_ref:    (TM, TK)   bf16  adjacency edge-count tile (exact small ints)
    xk_ref:   (TK, C)    bf16  neighbor-feature rows for this k tile
    xi_ref:   (TM, C)    bf16  root (self) feature rows for this row tile
    dinv_ref: (TM, 1)    f32   1 / max(deg, 1) for this row tile
    wl_ref:   (C, Cout)  bf16  neighbor-mean weight
    wr_ref:   (C, Cout)  bf16  root weight
    b_ref:    (1, Cout)  f32   bias
    o_ref:    (TM, Cout)       output tile (bf16 for layer 1, f32 for layer 2)
    acc_ref:  (TM, C)    f32   neighbor-sum accumulator (VMEM scratch)
    root_ref: (TM, Cout) f32   root-term scratch (x_i @ W_r + b)
    """
    k = pl.program_id(1)

    @pl.when(k == 0)
    def _():
        acc_ref[...] = jnp.zeros_like(acc_ref)
        # Root term is k-independent: compute it once, early, so it overlaps
        # the A/X DMAs of the remaining k steps instead of sitting on the
        # epilogue critical path.
        root_ref[...] = jnp.dot(xi_ref[...], wr_ref[...],
                                preferred_element_type=jnp.float32) + b_ref[...]

    # Streamed neighbor sum:  acc += A[i, k] @ X[k]   (bf16 in, f32 acc)
    acc_ref[...] += jnp.dot(a_ref[...], xk_ref[...],
                            preferred_element_type=jnp.float32)

    @pl.when(k == pl.num_programs(1) - 1)
    def _():
        # mean = deg_inv * sum  (exact f32 normalization, one VPU multiply);
        # out  = ReLU(mean @ W_l + (x_i @ W_r + b))
        mean = (acc_ref[...] * dinv_ref[...]).astype(jnp.bfloat16)
        h = jnp.dot(mean, wl_ref[...], preferred_element_type=jnp.float32)
        h = h + root_ref[...]
        o_ref[...] = jnp.maximum(h, 0.0).astype(o_ref.dtype)


def _sage_layer(a, x, deg_inv, w_l, w_r, b, tm, tk, out_dtype):
    """a: [Np,Np] bf16 counts, x: [Np,C] bf16, deg_inv: [Np,1] f32,
    w_l/w_r: [C,Cout] bf16, b: [1,Cout] f32."""
    n_pad = a.shape[0]
    c = x.shape[1]
    c_out = w_l.shape[1]
    grid = (n_pad // tm, n_pad // tk)
    out_itemsize = jnp.dtype(out_dtype).itemsize

    # Advisory scheduling hint for XLA around the custom call.
    flops = 2 * n_pad * n_pad * c + 2 * 2 * n_pad * c * c_out
    bytes_acc = (n_pad * n_pad * 2                    # A (bf16), read once
                 + grid[0] * n_pad * c * 2            # X k-stream per row tile
                 + n_pad * c * 2                      # X root rows
                 + 2 * c * c_out * 2                  # W_l, W_r
                 + n_pad * 4 + c_out * 4              # deg_inv, bias
                 + n_pad * c_out * out_itemsize)      # output
    cost = (pl.CostEstimate(flops=int(flops), transcendentals=0,
                            bytes_accessed=int(bytes_acc))
            if hasattr(pl, "CostEstimate") else None)

    # Only deepen A buffering when the reduction axis is long enough to benefit.
    a_buffers = 3 if grid[1] >= 3 else 2

    # Raise the scoped VMEM limit only if needed (v5e default ~16 MiB); stay
    # well under v7x's 64 MiB physical VMEM.
    vmem_est = _vmem_bytes(tm, tk, c, c_out, out_itemsize, a_buffers)
    compiler_kwargs = dict(dimension_semantics=("parallel", "arbitrary"))
    if vmem_est > 12 * 1024 * 1024:
        compiler_kwargs["vmem_limit_bytes"] = min(int(vmem_est * 3 // 2),
                                                  56 * 1024 * 1024)

    return pl.pallas_call(
        sage_layer_kernel,
        out_shape=jax.ShapeDtypeStruct((n_pad, c_out), out_dtype),
        grid_spec=pltpu.PrefetchScalarGridSpec(
            num_scalar_prefetch=0,
            grid=grid,
            in_specs=[
                _a_block_spec(tm, tk, a_buffers),                   # A tile
                pl.BlockSpec((tk, c), lambda i, k: (k, 0)),         # X (k rows)
                pl.BlockSpec((tm, c), lambda i, k: (i, 0)),         # X (root rows)
                pl.BlockSpec((tm, 1), lambda i, k: (i, 0)),         # deg_inv
                pl.BlockSpec((c, c_out), lambda i, k: (0, 0)),      # W_l
                pl.BlockSpec((c, c_out), lambda i, k: (0, 0)),      # W_r
                pl.BlockSpec((1, c_out), lambda i, k: (0, 0)),      # bias
            ],
            out_specs=pl.BlockSpec((tm, c_out), lambda i, k: (i, 0)),
            scratch_shapes=[pltpu.VMEM((tm, c), jnp.float32),       # acc
                            pltpu.VMEM((tm, c_out), jnp.float32)],  # root term
        ),
        compiler_params=pltpu.CompilerParams(**compiler_kwargs),
        cost_estimate=cost,
    )(a, x, x, deg_inv, w_l, w_r, b)   # x passed twice: k-stream + root rows


def graphsage_forward(x, edge_index, params):
    """x: [N, C_in] float32, edge_index: [2, E] int32 (row 0 = src, row 1 = dst)."""
    n, c_in = x.shape
    hidden = params["w1l"].shape[1]

    # --- glue: dense adjacency as *edge counts* (exact small integers in bf16)
    # plus f32 per-row 1/deg; the kernel applies the mean normalization.
    src, dst = edge_index[0], edge_index[1]
    adj = jnp.zeros((n, n), jnp.float32).at[dst, src].add(1.0)
    deg = jnp.sum(adj, axis=1, keepdims=True)
    deg_inv = 1.0 / jnp.maximum(deg, 1.0)

    # --- lane-dense padding (multiples of 128); tiles divide n_pad exactly.
    n_pad = _round_up(n, LANE)
    c_in_pad = _round_up(c_in, LANE)
    h_pad = _round_up(hidden, LANE)
    tm, tk = _pick_tiles(n_pad)

    a_p = jnp.zeros((n_pad, n_pad), jnp.bfloat16).at[:n, :n].set(
        adj.astype(jnp.bfloat16))
    x_p = jnp.zeros((n_pad, c_in_pad), jnp.bfloat16).at[:n, :c_in].set(
        x.astype(jnp.bfloat16))
    dinv_p = jnp.zeros((n_pad, 1), jnp.float32).at[:n].set(deg_inv)

    w1l = jnp.zeros((c_in_pad, h_pad), jnp.bfloat16).at[:c_in, :hidden].set(
        params["w1l"].astype(jnp.bfloat16))
    w1r = jnp.zeros((c_in_pad, h_pad), jnp.bfloat16).at[:c_in, :hidden].set(
        params["w1r"].astype(jnp.bfloat16))
    b1 = jnp.zeros((1, h_pad), jnp.float32).at[0, :hidden].set(params["b1"])

    w2l = jnp.zeros((h_pad, h_pad), jnp.bfloat16).at[:hidden, :hidden].set(
        params["w2l"].astype(jnp.bfloat16))
    w2r = jnp.zeros((h_pad, h_pad), jnp.bfloat16).at[:hidden, :hidden].set(
        params["w2r"].astype(jnp.bfloat16))
    b2 = jnp.zeros((1, h_pad), jnp.float32).at[0, :hidden].set(params["b2"])

    # Invariant: padded columns of a_p (>= n) are exactly zero, so layer 2's
    # aggregation never reads the padded rows of h1 (which equal ReLU(b1) != 0).
    h1 = _sage_layer(a_p, x_p, dinv_p, w1l, w1r, b1, tm, tk,
                     out_dtype=jnp.bfloat16)   # stays bf16: feeds layer 2 MXU
    h2 = _sage_layer(a_p, h1, dinv_p, w2l, w2r, b2, tm, tk,
                     out_dtype=jnp.float32)
    return h2[:n, :hidden]


def graphsage_reference(x, edge_index, params):
    """Pure-JAX f32 reference of the same math (sanity check)."""
    n = x.shape[0]
    src, dst = edge_index[0], edge_index[1]
    adj = jnp.zeros((n, n), jnp.float32).at[dst, src].add(1.0)
    deg = jnp.sum(adj, axis=1, keepdims=True)
    a_norm = adj / jnp.maximum(deg, 1.0)

    h = a_norm @ x @ params["w1l"] + params["b1"][None, :] + x @ params["w1r"]
    h = jnp.maximum(h, 0.0)
    h2 = a_norm @ h @ params["w2l"] + params["b2"][None, :] + h @ params["w2r"]
    return jnp.maximum(h2, 0.0)


def init_params(key, in_channels, hidden_channels):
    ks = jax.random.split(key, 6)
    scale1 = 1.0 / jnp.sqrt(in_channels)
    scale2 = 1.0 / jnp.sqrt(hidden_channels)
    return {
        # weights stored as [C_in, C_out] (transposed vs. torch Linear)
        "w1l": jax.random.normal(ks[0], (in_channels, hidden_channels), jnp.float32) * scale1,
        "w1r": jax.random.normal(ks[1], (in_channels, hidden_channels), jnp.float32) * scale1,
        "b1":  jax.random.normal(ks[2], (hidden_channels,), jnp.float32) * 0.01,
        "w2l": jax.random.normal(ks[3], (hidden_channels, hidden_channels), jnp.float32) * scale2,
        "w2r": jax.random.normal(ks[4], (hidden_channels, hidden_channels), jnp.float32) * scale2,
        "b2":  jax.random.normal(ks[5], (hidden_channels,), jnp.float32) * 0.01,
    }


if __name__ == "__main__":
    key = jax.random.PRNGKey(0)
    k_x, k_e, k_p = jax.random.split(key, 3)

    num_nodes = 64
    in_channels = 8
    hidden_channels = 32
    num_edges = 256

    x = jax.random.normal(k_x, (num_nodes, in_channels), jnp.float32)
    edge_index = jax.random.randint(k_e, (2, num_edges), 0, num_nodes, jnp.int32)
    params = init_params(k_p, in_channels, hidden_channels)

    out = graphsage_forward(x, edge_index, params)
    out = jax.block_until_ready(out)

    ref = graphsage_reference(x, edge_index, params)
    assert out.shape == (num_nodes, hidden_channels)
    # bf16 MXU operands (f32 accumulation + exact f32 deg normalization)
    max_err = float(jnp.max(jnp.abs(out - ref)))
    assert jnp.allclose(out, ref, atol=7.5e-2, rtol=5e-2), max_err

    print("KERNEL_OK")
</pallas_src>

<mosaic_0001>
module attributes {stable_mosaic.version = 11 : i64} {
  func.func @sage_layer_kernel(%arg0: i32, %arg1: i32, %arg2: memref<128x128xbf16, #tpu.memory_space<vmem>>, %arg3: memref<128x128xbf16, #tpu.memory_space<vmem>>, %arg4: memref<128x128xbf16, #tpu.memory_space<vmem>>, %arg5: memref<128x1xf32, #tpu.memory_space<vmem>>, %arg6: memref<128x128xbf16, #tpu.memory_space<vmem>>, %arg7: memref<128x128xbf16, #tpu.memory_space<vmem>>, %arg8: memref<1x128xf32, #tpu.memory_space<vmem>>, %arg9: memref<128x128xbf16, #tpu.memory_space<vmem>>, %arg10: memref<128x128xf32, #tpu.memory_space<vmem>>, %arg11: memref<128x128xf32, #tpu.memory_space<vmem>>) attributes {dimension_semantics = [#tpu.dimension_semantics<parallel>, #tpu.dimension_semantics<arbitrary>], iteration_bounds = array<i64: 1, 1>, scalar_prefetch = 0 : i64, scratch_operands = 2 : i64, tpu.core_type = #tpu.core_type<tc>, window_params = [{transform_indices = @transform_0, window_bounds = array<i64: 128, 128>}, {transform_indices = @transform_1, window_bounds = array<i64: 128, 128>}, {transform_indices = @transform_2, window_bounds = array<i64: 128, 128>}, {transform_indices = @transform_3, window_bounds = array<i64: 128, 1>}, {pipeline_mode = #tpu.pipeline_mode<synchronous>, transform_indices = @transform_4, window_bounds = array<i64: 128, 128>}, {pipeline_mode = #tpu.pipeline_mode<synchronous>, transform_indices = @transform_5, window_bounds = array<i64: 128, 128>}, {pipeline_mode = #tpu.pipeline_mode<synchronous>, transform_indices = @transform_6, window_bounds = array<i64: 1, 128>}, {transform_indices = @transform_7, window_bounds = array<i64: 128, 128>}]} {
    %c0_i32 = arith.constant 0 : i32
    %0 = arith.cmpi eq, %arg1, %c0_i32 : i32
    %1 = arith.extui %0 : i1 to i32
    %c0_i32_0 = arith.constant 0 : i32
    %2 = arith.cmpi ne, %1, %c0_i32_0 : i32
    scf.if %2 {
      %cst_10 = arith.constant 0.000000e+00 : f32
      %12 = vector.broadcast %cst_10 : f32 to vector<128x128xf32>
      %c0_11 = arith.constant 0 : index
      %c0_12 = arith.constant 0 : index
      %13 = vector.load %arg10[%c0_11, %c0_12] : memref<128x128xf32, #tpu.memory_space<vmem>>, vector<128x128xf32>
      tpu.vector_store %arg10[%c0_11, %c0_12], %12 {strides = array<i32>} : memref<128x128xf32, #tpu.memory_space<vmem>>, vector<128x128xf32>,
      %c0_13 = arith.constant 0 : index
      %c0_14 = arith.constant 0 : index
      %14 = vector.load %arg4[%c0_13, %c0_14] : memref<128x128xbf16, #tpu.memory_space<vmem>>, vector<128x128xbf16>
      %c0_15 = arith.constant 0 : index
      %c0_16 = arith.constant 0 : index
      %15 = vector.load %arg7[%c0_15, %c0_16] : memref<128x128xbf16, #tpu.memory_space<vmem>>, vector<128x128xbf16>
      %cst_17 = arith.constant dense<0.000000e+00> : vector<128x128xf32>
      %16 = tpu.matmul %14, %15, %cst_17 {dimension_numbers = #tpu.dot_dimension_numbers<[1], [0], [0], [1], [0, 0, 1, 1], [], []>} : vector<128x128xbf16>, vector<128x128xbf16>, vector<128x128xf32> -> vector<128x128xf32>
      %c0_18 = arith.constant 0 : index
      %c0_19 = arith.constant 0 : index
      %17 = vector.load %arg8[%c0_18, %c0_19] : memref<1x128xf32, #tpu.memory_space<vmem>>, vector<1x128xf32>
      %18 = vector.broadcast %17 : vector<1x128xf32> to vector<128x128xf32>
      %19 = arith.addf %16, %18 : vector<128x128xf32>
      %c0_20 = arith.constant 0 : index
      %c0_21 = arith.constant 0 : index
      %20 = vector.load %arg11[%c0_20, %c0_21] : memref<128x128xf32, #tpu.memory_space<vmem>>, vector<128x128xf32>
      tpu.vector_store %arg11[%c0_20, %c0_21], %19 {strides = array<i32>} : memref<128x128xf32, #tpu.memory_space<vmem>>, vector<128x128xf32>,
    } else {
    }
    %c0 = arith.constant 0 : index
    %c0_1 = arith.constant 0 : index
    %3 = vector.load %arg10[%c0, %c0_1] : memref<128x128xf32, #tpu.memory_space<vmem>>, vector<128x128xf32>
    %c0_2 = arith.constant 0 : index
    %c0_3 = arith.constant 0 : index
    %4 = vector.load %arg2[%c0_2, %c0_3] : memref<128x128xbf16, #tpu.memory_space<vmem>>, vector<128x128xbf16>
    %c0_4 = arith.constant 0 : index
    %c0_5 = arith.constant 0 : index
    %5 = vector.load %arg3[%c0_4, %c0_5] : memref<128x128xbf16, #tpu.memory_space<vmem>>, vector<128x128xbf16>
    %cst = arith.constant dense<0.000000e+00> : vector<128x128xf32>
    %6 = tpu.matmul %4, %5, %cst {dimension_numbers = #tpu.dot_dimension_numbers<[1], [0], [0], [1], [0, 0, 1, 1], [], []>} : vector<128x128xbf16>, vector<128x128xbf16>, vector<128x128xf32> -> vector<128x128xf32>
    %7 = arith.addf %3, %6 : vector<128x128xf32>
    %c0_6 = arith.constant 0 : index
    %c0_7 = arith.constant 0 : index
    %8 = vector.load %arg10[%c0_6, %c0_7] : memref<128x128xf32, #tpu.memory_space<vmem>>, vector<128x128xf32>
    tpu.vector_store %arg10[%c0_6, %c0_7], %7 {strides = array<i32>} : memref<128x128xf32, #tpu.memory_space<vmem>>, vector<128x128xf32>,
    %c0_i32_8 = arith.constant 0 : i32
    %9 = arith.cmpi eq, %arg1, %c0_i32_8 : i32
    %10 = arith.extui %9 : i1 to i32
    %c0_i32_9 = arith.constant 0 : i32
    %11 = arith.cmpi ne, %10, %c0_i32_9 : i32
    scf.if %11 {
      %c0_10 = arith.constant 0 : index
      %c0_11 = arith.constant 0 : index
      %12 = vector.load %arg10[%c0_10, %c0_11] : memref<128x128xf32, #tpu.memory_space<vmem>>, vector<128x128xf32>
      %c0_12 = arith.constant 0 : index
      %c0_13 = arith.constant 0 : index
      %13 = vector.load %arg5[%c0_12, %c0_13] : memref<128x1xf32, #tpu.memory_space<vmem>>, vector<128x1xf32>
      %14 = vector.broadcast %13 : vector<128x1xf32> to vector<128x128xf32>
      %15 = arith.mulf %12, %14 : vector<128x128xf32>
      %16 = arith.truncf %15 : vector<128x128xf32> to vector<128x128xbf16>
      %c0_14 = arith.constant 0 : index
      %c0_15 = arith.constant 0 : index
      %17 = vector.load %arg6[%c0_14, %c0_15] : memref<128x128xbf16, #tpu.memory_space<vmem>>, vector<128x128xbf16>
      %cst_16 = arith.constant dense<0.000000e+00> : vector<128x128xf32>
      %18 = tpu.matmul %16, %17, %cst_16 {dimension_numbers = #tpu.dot_dimension_numbers<[1], [0], [0], [1], [0, 0, 1, 1], [], []>} : vector<128x128xbf16>, vector<128x128xbf16>, vector<128x128xf32> -> vector<128x128xf32>
      %c0_17 = arith.constant 0 : index
      %c0_18 = arith.constant 0 : index
      %19 = vector.load %arg11[%c0_17, %c0_18] : memref<128x128xf32, #tpu.memory_space<vmem>>, vector<128x128xf32>
      %20 = arith.addf %18, %19 : vector<128x128xf32>
      %cst_19 = arith.constant 0.000000e+00 : f32
      %21 = vector.broadcast %cst_19 : f32 to vector<128x128xf32>
      %22 = arith.maximumf %20, %21 : vector<128x128xf32>
      %23 = arith.truncf %22 : vector<128x128xf32> to vector<128x128xbf16>
      %c0_20 = arith.constant 0 : index
      %c0_21 = arith.constant 0 : index
      %24 = vector.load %arg9[%c0_20, %c0_21] : memref<128x128xbf16, #tpu.memory_space<vmem>>, vector<128x128xbf16>
      tpu.vector_store %arg9[%c0_20, %c0_21], %23 {strides = array<i32>} : memref<128x128xbf16, #tpu.memory_space<vmem>>, vector<128x128xbf16>,
    } else {
    }
    return
  }
  func.func @transform_0(%arg0: i32, %arg1: i32) -> (i32, i32) {
    %c0_i32 = arith.constant 0 : i32
    return %arg0, %arg1 : i32, i32
  }
  func.func @transform_1(%arg0: i32, %arg1: i32) -> (i32, i32) {
    %c0_i32 = arith.constant 0 : i32
    %c0_i32_0 = arith.constant 0 : i32
    return %arg1, %c0_i32 : i32, i32
  }
  func.func @transform_2(%arg0: i32, %arg1: i32) -> (i32, i32) {
    %c0_i32 = arith.constant 0 : i32
    %c0_i32_0 = arith.constant 0 : i32
    return %arg0, %c0_i32 : i32, i32
  }
  func.func @transform_3(%arg0: i32, %arg1: i32) -> (i32, i32) {
    %c0_i32 = arith.constant 0 : i32
    %c0_i32_0 = arith.constant 0 : i32
    return %arg0, %c0_i32 : i32, i32
  }
  func.func @transform_4(%arg0: i32, %arg1: i32) -> (i32, i32) {
    %c0_i32 = arith.constant 0 : i32
    %c0_i32_0 = arith.constant 0 : i32
    %c0_i32_1 = arith.constant 0 : i32
    return %c0_i32, %c0_i32_0 : i32, i32
  }
  func.func @transform_5(%arg0: i32, %arg1: i32) -> (i32, i32) {
    %c0_i32 = arith.constant 0 : i32
    %c0_i32_0 = arith.constant 0 : i32
    %c0_i32_1 = arith.constant 0 : i32
    return %c0_i32, %c0_i32_0 : i32, i32
  }
  func.func @transform_6(%arg0: i32, %arg1: i32) -> (i32, i32) {
    %c0_i32 = arith.constant 0 : i32
    %c0_i32_0 = arith.constant 0 : i32
    %c0_i32_1 = arith.constant 0 : i32
    return %c0_i32, %c0_i32_0 : i32, i32
  }
  func.func @transform_7(%arg0: i32, %arg1: i32) -> (i32, i32) {
    %c0_i32 = arith.constant 0 : i32
    %c0_i32_0 = arith.constant 0 : i32
    return %arg0, %c0_i32 : i32, i32
  }
}

</mosaic_0001>

<bundles_post_ra>
// kernel: tpu_custom_call.1
= control target key start
LH: loop header
LB: loop body
LE: loop exit
PB: predicated region body
PF: predicated region fallthrough
CT: control target
= control target key end

     0   :  { %12 = vsyncpa [#allocation5], 0  ;;  %s1652_s0 = inlined_call_operand.vmem [shape: bf16[128,128], index: 0, kind: input, shape index: {}]   ;;  %s1653_s1 = inlined_call_operand.vmem [shape: bf16[128,128], index: 1, kind: input, shape index: {}]   ;;  %s1654_s2 = inlined_call_operand.hbm [shape: bf16[128,128], index: 2, kind: input, shape index: {}]   ;;  %s1655_s3 = inlined_call_operand.vmem [shape: f32[128,1], index: 3, kind: input, shape index: {}]   ;;  %s1656_s4 = inlined_call_operand.hbm [shape: bf16[128,128], index: 4, kind: input, shape index: {}]   ;;  %s1657_s5 = inlined_call_operand.hbm [shape: bf16[128,128], index: 5, kind: input, shape index: {}]   ;;  %s1658_s6 = inlined_call_operand.vmem [shape: f32[1,128], index: 6, kind: input, shape index: {}]   ;;  %s1659_s7 = inlined_call_operand.hbm [shape: bf16[128,128], index: 7, kind: output, shape index: {}]  }
   0x1   :  { %13 = vsyncpa [#allocation8], 0 }
   0x2   :  { %14 = vsyncpa [#allocation6], 0  ;;  %s1455_s24 = smov [#allocation7]   ;;  %s1456_s26 = smov [#allocation4]  }
   0x3   :  { %s38_s25 = sshll.u32 %s1455_s24, 4  ;;  %s24_s27 = sshll.u32 %s1456_s26, 4  ;;  %s39_s25 = int_to_ptr.vmem [resolvable:$true] %s38_s25  ;;  %s25_s27 = int_to_ptr.vmem [resolvable:$true] %s24_s27 }
   0x4   :  { %s1377_s28 = scalar_lea.vmem %s39_s25, 1024  ;;  %p1382_p1 = scmp.lt.s32.totalorder %s39_s25, %s39_s25 }
   0x5   :  { %p1378_p0 = scmp.ne.s32.totalorder %s39_s25, %s1377_s28  ;;  %p1383_p2 = scmp.lt.s32.totalorder %s1377_s28, %s1377_s28 }
   0x7   :  { %p1384_p3 = por %p1383_p2, %p1382_p1 }
   0x9   :  { %p1385_p4 = pnand %p1384_p3, %p1378_p0 }
   0xb   :  { %1388 = shalt.err (!%p1385_p4)
}
   0xc   :  { %s1457_s29 = smov 64   ;;  %s1458_s30 = smov 4  }
   0xd   :  { %44 = dma.hbm_to_vmem [thread:$0]  %s1656_s4, 1024, %s39_s25, [#allocation8], %s1457_s29, %s1457_s29, %s1458_s30  }
   0xe   :  { %s1397_s10 = scalar_lea.vmem %s25_s27, 1024  ;;  %p1402_p6 = scmp.lt.s32.totalorder %s25_s27, %s25_s27 }
   0xf   :  { %p1398_p5 = scmp.ne.s32.totalorder %s25_s27, %s1397_s10  ;;  %p1403_p7 = scmp.lt.s32.totalorder %s1397_s10, %s1397_s10 }
  0x11   :  { %p1404_p8 = por %p1403_p7, %p1402_p6 }
  0x13   :  { %p1405_p9 = pnand %p1404_p8, %p1398_p5 }
  0x15   :  { %1408 = shalt.err (!%p1405_p9)
}
  0x16   :  { %30 = dma.hbm_to_vmem [thread:$0]  %s1654_s2, 1024, %s25_s27, [#allocation5], %s1457_s29, %s1457_s29, %s1458_s30  }
  0x17   :  { %s1459_s13 = smov [#allocation9]  }
  0x18   :  { %s50_s14 = sshll.u32 %s1459_s13, 4  ;;  %s51_s14 = int_to_ptr.vmem [resolvable:$true] %s50_s14 }
  0x19   :  { %s1417_s15 = scalar_lea.vmem %s51_s14, 1024  ;;  %p1422_p11 = scmp.lt.s32.totalorder %s51_s14, %s51_s14 }
  0x1a   :  { %p1418_p10 = scmp.ne.s32.totalorder %s51_s14, %s1417_s15  ;;  %p1423_p12 = scmp.lt.s32.totalorder %s1417_s15, %s1417_s15 }
  0x1c   :  { %p1424_p13 = por %p1423_p12, %p1422_p11 }
  0x1e   :  { %p1425_p0 = pnand %p1424_p13, %p1418_p10 }
  0x20   :  { %1428 = shalt.err (!%p1425_p0)
}
  0x21   :  { %56 = dma.hbm_to_vmem [thread:$0]  %s1657_s5, 1024, %s51_s14, [#allocation8], %s1457_s29, %s1457_s29, %s1458_s30  }
  0x22   :  { %1449 = dma.done.wait [#allocation5], 1024  }
  0x23   :  { %1450 = vsyncadd [#allocation5], 4294966272 }
  0x24   :  { %1451 = dma.done.wait [#allocation8], 2048  }
  0x25   :  { %1452 = vsyncadd [#allocation8], 4294965248  ;;  %v1460_v0 = vmov 0   ;;  %v1329_v1 = vld [vmem:[%s1653_s1 + $0x38] sm:$0xff]   ;;  %v1330_v2 = vld [vmem:[%s1653_s1 + $0x30] sm:$0xff]  }
  0x26   :  { %1328 = vset.pattern.permute.xlu1 %v1460_v0  ;;  %1327 = vset.pattern.permute.xlu0 %v1460_v0  ;;  %v1331_v3 = vld [vmem:[%s1653_s1 + $0x28] sm:$0xff]   ;;  %v1332_v4 = vld [vmem:[%s1653_s1 + $0x20] sm:$0xff]   ;;  %v1333_v6 = vld [vmem:[%s1653_s1 + $0x18] sm:$0xff]  }
  0x27   :  { %1240 = vmatprep.subr.bf16.mxu1 %v1329_v1  ;;  %v1337_v5 = vld [vmem:[%s1652_s0] sm:$0xff]   ;;  %v1334_v7 = vld [vmem:[%s1653_s1 + $0x10] sm:$0xff]   ;;  %v638_v10 = vld [vmem:[%s1655_s3 + $0x48] sm:$0xff] }
  0x28   :  { %1241 = vmatpush3.bf16.msra.mxu1 %v1329_v1  ;;  %1256 = vmatprep.mubr.bf16.mxu1 %v1337_v5  ;;  %v637_v8 = vld [vmem:[%s1655_s3 + $0x40] sm:$0xff]  ;;  %v630_v11 = vld [vmem:[%s1655_s3 + $0x8] sm:$0xff]  ;;  %v632_v13 = vld [vmem:[%s1655_s3 + $0x18] sm:$0xff] }
  0x29   :  { %1242 = vmatprep.subr.bf16.mxu1 %v1330_v2  ;;  %v629_v9 = vld [vmem:[%s1655_s3] sm:$0xff]  ;;  %687 = vperm.xlu1 %1328, %v637_v8   ;;  %v1335_v12 = vld [vmem:[%s1653_s1 + $0x8] sm:$0xff]   ;;  %v631_v14 = vld [vmem:[%s1655_s3 + $0x10] sm:$0xff] }
  0x2a   :  { %647 = vperm.xlu0 %1327, %v629_v9   ;;  %v1345_v15 = vld [vmem:[#allocation9 + $0x38] sm:$0xff]   ;;  %v1346_v16 = vld [vmem:[#allocation9 + $0x30] sm:$0xff]   ;;  %v1336_v17 = vld [vmem:[%s1653_s1] sm:$0xff]  }
  0x2b   :  { %1208 = vmatprep.subr.bf16.mxu0 %v1345_v15  ;;  %v640_v18 = vld [vmem:[%s1655_s3 + $0x58] sm:$0xff]  ;;  %v639_v19 = vld [vmem:[%s1655_s3 + $0x50] sm:$0xff]  ;;  %v1347_v20 = vld [vmem:[#allocation9 + $0x28] sm:$0xff]  }
  0x2c   :  { %1243 = vmatpush3.bf16.msra.mxu1 %v1330_v2  ;;  %1209 = vmatpush3.bf16.msra.mxu0 %v1345_v15  ;;  %v1338_v21 = vld [vmem:[%s1652_s0 + $0x8] sm:$0xff]   ;;  %v1339_v23 = vld [vmem:[%s1652_s0 + $0x10] sm:$0xff]   ;;  %v633_v24 = vld [vmem:[%s1655_s3 + $0x20] sm:$0xff] }
  0x2d   :  { %1244 = vmatprep.subr.bf16.mxu1 %v1331_v3  ;;  %692 = vperm.xlu1 %1328, %v638_v10   ;;  %v634_v22 = vld [vmem:[%s1655_s3 + $0x28] sm:$0xff]  ;;  %v1353_v25 = vld [vmem:[#allocation4] sm:$0xff]   ;;  %v1355_v29 = vld [vmem:[#allocation7 + $0x38] sm:$0xff]  }
  0x2e   :  { %652 = vperm.xlu0 %1327, %v630_v11   ;;  %1210 = vmatprep.subr.bf16.mxu0 %v1346_v16  ;;  %v1348_v26 = vld [vmem:[#allocation9 + $0x20] sm:$0xff]   ;;  %v642_v27 = vld [vmem:[%s1655_s3 + $0x68] sm:$0xff]  ;;  %v1349_v30 = vld [vmem:[#allocation9 + $0x18] sm:$0xff]  }
  0x2f   :  { %1224 = vmatprep.mubr.bf16.mxu0 %v1353_v25  ;;  %v641_v28 = vld [vmem:[%s1655_s3 + $0x60] sm:$0xff]  ;;  %v1340_v31 = vld [vmem:[%s1652_s0 + $0x18] sm:$0xff]   ;;  %v1356_v34 = vld [vmem:[#allocation7 + $0x30] sm:$0xff]  }
  0x30   :  { %1245 = vmatpush3.bf16.msra.mxu1 %v1331_v3  ;;  %1211 = vmatpush3.bf16.msra.mxu0 %v1346_v16  ;;  %v636_v32 = vld [vmem:[%s1655_s3 + $0x38] sm:$0xff]  ;;  %v1341_v33 = vld [vmem:[%s1652_s0 + $0x20] sm:$0xff]   ;;  %v635_v35 = vld [vmem:[%s1655_s3 + $0x30] sm:$0xff] }
  0x31   :  { %1246 = vmatprep.subr.bf16.mxu1 %v1332_v4  ;;  %662 = vperm.xlu1 %1328, %v632_v13   ;;  %v1350_v36 = vld [vmem:[#allocation9 + $0x10] sm:$0xff]   ;;  %v644_v37 = vld [vmem:[%s1655_s3 + $0x78] sm:$0xff]  ;;  %v1351_v39 = vld [vmem:[#allocation9 + $0x8] sm:$0xff]  }
  0x32   :  { %657 = vperm.xlu0 %1327, %v631_v14   ;;  %1212 = vmatprep.subr.bf16.mxu0 %v1347_v20  ;;  %v643_v38 = vld [vmem:[%s1655_s3 + $0x70] sm:$0xff]  ;;  %v1359_v40 = vld [vmem:[#allocation7 + $0x28] sm:$0xff]   ;;  %v1352_v43 = vld [vmem:[#allocation9] sm:$0xff]  }
  0x33   :  { %v1342_v41 = vld [vmem:[%s1652_s0 + $0x28] sm:$0xff]   ;;  %v1343_v42 = vld [vmem:[%s1652_s0 + $0x30] sm:$0xff]   ;;  %v1360_v44 = vld [vmem:[#allocation7 + $0x20] sm:$0xff]  }
  0x34   :  { %1247 = vmatpush3.bf16.msra.mxu1 %v1332_v4  ;;  %1213 = vmatpush3.bf16.msra.mxu0 %v1347_v20  ;;  %v1363_v45 = vld [vmem:[#allocation7 + $0x18] sm:$0xff]   ;;  %v1354_v46 = vld [vmem:[#allocation4 + $0x8] sm:$0xff]   ;;  %v1357_v48 = vld [vmem:[#allocation4 + $0x10] sm:$0xff]  }
  0x35   :  { %1248 = vmatprep.subr.bf16.mxu1 %v1333_v6  ;;  %702 = vperm.xlu1 %1328, %v640_v18   ;;  %v1344_v47 = vld [vmem:[%s1652_s0 + $0x38] sm:$0xff]   ;;  %v1361_v50 = vld [vmem:[#allocation4 + $0x20] sm:$0xff]   ;;  %v1362_v51 = vld [vmem:[#allocation4 + $0x28] sm:$0xff]  }
  0x36   :  { %697 = vperm.xlu0 %1327, %v639_v19   ;;  %1214 = vmatprep.subr.bf16.mxu0 %v1348_v26  ;;  %v1358_v49 = vld [vmem:[#allocation4 + $0x18] sm:$0xff]   ;;  %v1364_v52 = vld [vmem:[#allocation7 + $0x10] sm:$0xff]   ;;  %v1367_v55 = vld [vmem:[#allocation7 + $0x8] sm:$0xff]  }
  0x37   :  { %v1365_v53 = vld [vmem:[#allocation4 + $0x30] sm:$0xff]   ;;  %v1366_v54 = vld [vmem:[#allocation4 + $0x38] sm:$0xff]   ;;  %v1368_v56 = vld [vmem:[#allocation7] sm:$0xff]  }
  0x38   :  { %1249 = vmatpush3.bf16.msra.mxu1 %v1333_v6  ;;  %1215 = vmatpush3.bf16.msra.mxu0 %v1348_v26 }
  0x39   :  { %1250 = vmatprep.subr.bf16.mxu1 %v1334_v7  ;;  %672 = vperm.xlu1 %1328, %v634_v22  }
  0x3a   :  { %667 = vperm.xlu0 %1327, %v633_v24   ;;  %1216 = vmatprep.subr.bf16.mxu0 %v1349_v30 }
  0x3c   :  { %1251 = vmatpush3.bf16.msra.mxu1 %v1334_v7  ;;  %1217 = vmatpush3.bf16.msra.mxu0 %v1349_v30 }
  0x3d   :  { %1252 = vmatprep.subr.bf16.mxu1 %v1335_v12  ;;  %712 = vperm.xlu1 %1328, %v642_v27  }
  0x3e   :  { %707 = vperm.xlu0 %1327, %v641_v28   ;;  %1218 = vmatprep.subr.bf16.mxu0 %v1350_v36 }
  0x40   :  { %1253 = vmatpush3.bf16.msra.mxu1 %v1335_v12  ;;  %1219 = vmatpush3.bf16.msra.mxu0 %v1350_v36 }
  0x41   :  { %1254 = vmatprep.subr.bf16.mxu1 %v1336_v17  ;;  %682 = vperm.xlu1 %1328, %v636_v32  }
  0x42   :  { %677 = vperm.xlu0 %1327, %v635_v35   ;;  %1220 = vmatprep.subr.bf16.mxu0 %v1351_v39 }
  0x44   :  { %1255 = vmatpush3.bf16.msra.mxu1 %v1336_v17  ;;  %1221 = vmatpush3.bf16.msra.mxu0 %v1351_v39 }
  0x45   :  { %1304 = vmatprep.subr.bf16.mxu1 %v1355_v29  ;;  %722 = vperm.xlu1 %1328, %v644_v37  }
  0x46   :  { %717 = vperm.xlu0 %1327, %v643_v38   ;;  %1222 = vmatprep.subr.bf16.mxu0 %v1352_v43 }
  0x47   :  { %1257 = vmatmul.mubr.bf16.vlgmr.msra.gmra.mxu1 %v1338_v21 }
  0x48   :  { %1260 = vmatprep.mubr.bf16.mxu1 %v1339_v23  ;;  %1312 = vmatpush3.bf16.msra.mxu1 %v1355_v29 }
  0x49   :  { %1305 = vmatprep.subr.bf16.mxu1 %v1356_v34  ;;  %1223 = vmatpush3.bf16.msra.mxu0 %v1352_v43 }
  0x4a   :  { %1272 = vmatprep.subr.bf16.mxu0 %v1355_v29 }
  0x4c   :  { %1313 = vmatpush3.bf16.msra.mxu1 %v1356_v34  ;;  %1225 = vmatmul.mubr.bf16.vlgmr.msra.gmra.mxu0 %v1354_v46 }
  0x4d   :  { %1306 = vmatprep.subr.bf16.mxu1 %v1359_v40  ;;  %1273 = vmatpush3.bf16.msra.mxu0 %v1355_v29 }
  0x4e   :  { %1274 = vmatprep.subr.bf16.mxu0 %v1356_v34  ;;  %1228 = vmatprep.mubr.bf16.mxu0 %v1357_v48 }
  0x4f   :  { %1261 = vmatmul.mubr.bf16.gmra.mxu1 %v1340_v31 }
  0x50   :  { %1264 = vmatprep.mubr.bf16.mxu1 %v1341_v33  ;;  %1314 = vmatpush3.bf16.msra.mxu1 %v1359_v40 }
  0x51   :  { %1307 = vmatprep.subr.bf16.mxu1 %v1360_v44  ;;  %1275 = vmatpush3.bf16.msra.mxu0 %v1356_v34 }
  0x52   :  { %1276 = vmatprep.subr.bf16.mxu0 %v1359_v40 }
  0x54   :  { %1315 = vmatpush3.bf16.msra.mxu1 %v1360_v44  ;;  %1229 = vmatmul.mubr.bf16.gmra.mxu0 %v1358_v49 }
  0x55   :  { %1308 = vmatprep.subr.bf16.mxu1 %v1363_v45  ;;  %1277 = vmatpush3.bf16.msra.mxu0 %v1359_v40 }
  0x56   :  { %1232 = vmatprep.mubr.bf16.mxu0 %v1361_v50  ;;  %1278 = vmatprep.subr.bf16.mxu0 %v1360_v44 }
  0x57   :  { %1265 = vmatmul.mubr.bf16.gmra.mxu1 %v1342_v41 }
  0x58   :  { %1268 = vmatprep.mubr.bf16.mxu1 %v1343_v42  ;;  %1316 = vmatpush3.bf16.msra.mxu1 %v1363_v45 }
  0x59   :  { %1279 = vmatpush3.bf16.msra.mxu0 %v1360_v44  ;;  %1309 = vmatprep.subr.bf16.mxu1 %v1364_v52 }
  0x5a   :  { %1280 = vmatprep.subr.bf16.mxu0 %v1363_v45 }
  0x5c   :  { %1233 = vmatmul.mubr.bf16.gmra.mxu0 %v1362_v51  ;;  %1317 = vmatpush3.bf16.msra.mxu1 %v1364_v52 }
  0x5d   :  { %1281 = vmatpush3.bf16.msra.mxu0 %v1363_v45  ;;  %1236 = vmatprep.mubr.bf16.mxu0 %v1365_v53 }
  0x5e   :  { %1282 = vmatprep.subr.bf16.mxu0 %v1364_v52  ;;  %1310 = vmatprep.subr.bf16.mxu1 %v1367_v55 }
  0x5f   :  { %1269 = vmatmul.mubr.bf16.gmra.mxu1 %v1344_v47 }
  0x60   :  { %1318 = vmatpush3.bf16.msra.mxu1 %v1367_v55 }
  0x61   :  { %1283 = vmatpush3.bf16.msra.mxu0 %v1364_v52  ;;  %1311 = vmatprep.subr.bf16.mxu1 %v1368_v56 }
  0x62   :  { %1284 = vmatprep.subr.bf16.mxu0 %v1367_v55 }
  0x64   :  { %1237 = vmatmul.mubr.bf16.gmra.mxu0 %v1366_v54  ;;  %1319 = vmatpush3.bf16.msra.mxu1 %v1368_v56 }
  0x65   :  { %1285 = vmatpush3.bf16.msra.mxu0 %v1367_v55 }
  0x66   :  { %1286 = vmatprep.subr.bf16.mxu0 %v1368_v56 }
  0x69   :  { %1287 = vmatpush3.bf16.msra.mxu0 %v1368_v56 }
  0xa4   :  { %v688_v57 = vpop.permute.xlu1 %687 }
  0xa5   :  { %v648_v58 = vpop.permute.xlu0 %647 }
  0xa8   :  { %v693_v59 = vpop.permute.xlu1 %692 }
  0xa9   :  { %v653_v60 = vpop.permute.xlu0 %652 }
  0xac   :  { %v663_v61 = vpop.permute.xlu1 %662 }
  0xad   :  { %v658_v62 = vpop.permute.xlu0 %657 }
  0xb0   :  { %v703_v63 = vpop.permute.xlu1 %702 }
  0xb1   :  { %v698_v0 = vpop.permute.xlu0 %697 }
  0xb4   :  { %v673_v2 = vpop.permute.xlu1 %672 }
  0xb5   :  { %v668_v4 = vpop.permute.xlu0 %667 }
  0xb8   :  { %v713_v8 = vpop.permute.xlu1 %712 }
  0xb9   :  { %v708_v13 = vpop.permute.xlu0 %707 }
  0xbc   :  { %v683_v18 = vpop.permute.xlu1 %682 }
  0xbd   :  { %v678_v21 = vpop.permute.xlu0 %677 }
  0xc0   :  { %v723_v40 = vpop.permute.xlu1 %722 }
  0xc1   :  { %v718_v43 = vpop.permute.xlu0 %717 }
 0x107   :  { %v1258_v1 = vpop.f32.mrf.mxu1 }
 0x108   :  { %v727_v11 = vmul.f32 %v1258_v1, %v658_v62  ;;  %v1625_v1 = vld [vmem:[%s1658_s6] ss:$0 sm:$0xff]  ;;  %s1461_s6 = smov [#allocation10]  }
 0x109   :  { %v515_v3 = vpop.f32.mrf.mxu1  ;;  %s1027_s8 = sshll.u32 %s1461_s6, 4  ;;  %s1028_s8 = int_to_ptr.vmem [resolvable:$true] %s1027_s8 }
 0x10a   :  { %v725_v9 = vmul.f32 %v648_v58, %v515_v3  ;;  %s1429_s9 = scalar_lea.vmem %s1028_s8, 1024  ;;  %p1434_p2 = scmp.lt.s32.totalorder %s1028_s8, %s1028_s8 }
 0x10b   :  { %v1259_v5 = vpop.f32.mrf.mxu1  ;;  %p1430_p1 = scmp.ne.s32.totalorder %s1028_s8, %s1429_s9  ;;  %p1435_p3 = scmp.lt.s32.totalorder %s1429_s9, %s1429_s9 }
 0x10c   :  { %v728_v6 = vmul.f32 %v1259_v5, %v663_v61  ;;  %v1226_v49 = vpop.f32.mrf.mxu0 }
 0x10d   :  { %v518_v7 = vpop.f32.mrf.mxu1  ;;  %v267_v3 = vadd.f32 %v1226_v49, %v1625_v1  ;;  %p1436_p4 = por %p1435_p3, %p1434_p2 }
 0x10e   :  { %v726_v10 = vmul.f32 %v653_v60, %v518_v7  ;;  %v742_v15 = vpack.c.bf16 %v728_v6, %v727_v11  ;;  %v258_v50 = vpop.f32.mrf.mxu0 }
 0x10f   :  { %v1262_v12 = vpop.f32.mrf.mxu1  ;;  %v259_v5 = vadd.f32 %v1625_v1, %v258_v50  ;;  %p1437_p5 = pnand %p1436_p4, %p1430_p1 }
 0x110   :  { %v741_v14 = vpack.c.bf16 %v726_v10, %v725_v9  ;;  %v731_v24 = vmul.f32 %v1262_v12, %v678_v21  ;;  %v1227_v51 = vpop.f32.mrf.mxu0 }
 0x111   :  { %v531_v16 = vpop.f32.mrf.mxu1  ;;  %v270_v6 = vadd.f32 %v1227_v51, %v1625_v1 }
 0x112   :  { %1288 = vmatprep.mubr.bf16.mxu0 %v741_v14  ;;  %v729_v22 = vmul.f32 %v668_v4, %v531_v16  ;;  %v261_v52 = vpop.f32.mrf.mxu0 }
 0x113   :  { %v1263_v17 = vpop.f32.mrf.mxu1  ;;  %1289 = vmatmul.mubr.bf16.vlgmr.msra.gmra.mxu0 %v742_v15  ;;  %v262_v9 = vadd.f32 %v1625_v1, %v261_v52 }
 0x114   :  { %v732_v19 = vmul.f32 %v1263_v17, %v683_v18  ;;  %v1230_v53 = vpop.f32.mrf.mxu0 }
 0x115   :  { %v534_v20 = vpop.f32.mrf.mxu1  ;;  %v283_v17 = vadd.f32 %v1230_v53, %v1625_v1 }
 0x116   :  { %v730_v23 = vmul.f32 %v673_v2, %v534_v20  ;;  %v744_v27 = vpack.c.bf16 %v732_v19, %v731_v24  ;;  %v274_v54 = vpop.f32.mrf.mxu0 }
 0x117   :  { %v1266_v25 = vpop.f32.mrf.mxu1 }
 0x118   :  { %v743_v26 = vpack.c.bf16 %v730_v23, %v729_v22  ;;  %v735_v34 = vmul.f32 %v1266_v25, %v698_v0  ;;  %v1231_v55 = vpop.f32.mrf.mxu0  ;;  %v275_v22 = vadd.f32 %v1625_v1, %v274_v54 }
 0x119   :  { %v547_v28 = vpop.f32.mrf.mxu1  ;;  %v286_v23 = vadd.f32 %v1231_v55, %v1625_v1 }
 0x11a   :  { %1292 = vmatprep.mubr.bf16.mxu0 %v743_v26  ;;  %v733_v32 = vmul.f32 %v688_v57, %v547_v28  ;;  %v277_v56 = vpop.f32.mrf.mxu0 }
 0x11b   :  { %v1267_v29 = vpop.f32.mrf.mxu1  ;;  %1293 = vmatmul.mubr.bf16.gmra.mxu0 %v744_v27  ;;  %v278_v27 = vadd.f32 %v1625_v1, %v277_v56 }
 0x11c   :  { %v736_v30 = vmul.f32 %v1267_v29, %v703_v63  ;;  %v1234_v57 = vpop.f32.mrf.mxu0 }
 0x11d   :  { %v550_v31 = vpop.f32.mrf.mxu1 }
 0x11e   :  { %v734_v33 = vmul.f32 %v693_v59, %v550_v31  ;;  %v746_v37 = vpack.c.bf16 %v736_v30, %v735_v34  ;;  %v290_v58 = vpop.f32.mrf.mxu0 }
 0x11f   :  { %v1270_v35 = vpop.f32.mrf.mxu1 }
 0x120   :  { %v745_v36 = vpack.c.bf16 %v734_v33, %v733_v32  ;;  %v739_v46 = vmul.f32 %v1270_v35, %v718_v43  ;;  %v1235_v59 = vpop.f32.mrf.mxu0  ;;  %v299_v35 = vadd.f32 %v1234_v57, %v1625_v1 }
 0x121   :  { %v563_v38 = vpop.f32.mrf.mxu1 }
 0x122   :  { %1296 = vmatprep.mubr.bf16.mxu1 %v745_v36  ;;  %v737_v44 = vmul.f32 %v708_v13, %v563_v38  ;;  %v293_v60 = vpop.f32.mrf.mxu0 }
 0x123   :  { %v1271_v39 = vpop.f32.mrf.mxu1  ;;  %1297 = vmatmul.mubr.bf16.vlgmr.msra.gmra.mxu1 %v746_v37 }
 0x124   :  { %v740_v41 = vmul.f32 %v1271_v39, %v723_v40  ;;  %v1238_v61 = vpop.f32.mrf.mxu0  ;;  %v291_v40 = vadd.f32 %v1625_v1, %v290_v58 }
 0x125   :  { %v566_v42 = vpop.f32.mrf.mxu1  ;;  %v315_v53 = vadd.f32 %v1238_v61, %v1625_v1 }
 0x126   :  { %v738_v45 = vmul.f32 %v713_v8, %v566_v42  ;;  %v748_v48 = vpack.c.bf16 %v740_v41, %v739_v46  ;;  %v1616_v62 = vpop.f32.mrf.mxu0  ;;  %v302_v41 = vadd.f32 %v1235_v59, %v1625_v1 }
 0x127   :  { %v307_v58 = vadd.f32 %v1625_v1, %v1616_v62 }
 0x128   :  { %v747_v47 = vpack.c.bf16 %v738_v45, %v737_v44  ;;  %v1618_v63 = vpop.f32.mrf.mxu0  ;;  %v294_v45 = vadd.f32 %v1625_v1, %v293_v60 }
 0x129   :  { %v318_v59 = vadd.f32 %v1618_v63, %v1625_v1 }
 0x12a   :  { %1300 = vmatprep.mubr.bf16.mxu1 %v747_v47  ;;  %v1620_v0 = vpop.f32.mrf.mxu0 }
 0x12b   :  { %1301 = vmatmul.mubr.bf16.gmra.mxu1 %v748_v48 }
 0x1d3   :  { %v1290_v2 = vpop.f32.mrf.mxu0 }
 0x1d4   :  { %v872_v7 = vadd.f32 %v1290_v2, %v267_v3 }
 0x1d5   :  { %v863_v4 = vpop.f32.mrf.mxu0 }
 0x1d6   :  { %v864_v10 = vadd.f32 %v863_v4, %v259_v5  ;;  %v928_v13 = vmax.f32 %v872_v7, 0.0  ;;  %v310_v4 = vadd.f32 %v1625_v1, %v1620_v0 }
 0x1d7   :  { %v1291_v8 = vpop.f32.mrf.mxu0 }
 0x1d8   :  { %v875_v11 = vadd.f32 %v1291_v8, %v270_v6  ;;  %v926_v18 = vmax.f32 %v864_v10, 0.0 }
 0x1d9   :  { %v866_v12 = vpop.f32.mrf.mxu0 }
 0x1da   :  { %v929_v14 = vmax.f32 %v875_v11, 0.0  ;;  %v867_v15 = vadd.f32 %v866_v12, %v262_v9 }
 0x1db   :  { %v1294_v16 = vpop.f32.mrf.mxu0 }
 0x1dc   :  { %v1121_v19 = vpack.c.bf16 %v929_v14, %v928_v13  ;;  %v927_v20 = vmax.f32 %v867_v15, 0.0  ;;  %v888_v25 = vadd.f32 %v1294_v16, %v283_v17 }
 0x1dd   :  { %v879_v21 = vpop.f32.mrf.mxu0 }
 0x1de   :  { %1153 = vst [vmem:[#allocation10 + $0x8] sm:$0xff] %v1121_v19   ;;  %v1116_v24 = vpack.c.bf16 %v927_v20, %v926_v18  ;;  %v880_v28 = vadd.f32 %v879_v21, %v275_v22  ;;  %v932_v31 = vmax.f32 %v888_v25, 0.0 }
 0x1df   :  { %v1295_v26 = vpop.f32.mrf.mxu0 }
 0x1e0   :  { %1117 = vst [vmem:[#allocation10] sm:$0xff] %v1116_v24   ;;  %v891_v29 = vadd.f32 %v1295_v26, %v286_v23  ;;  %v930_v36 = vmax.f32 %v880_v28, 0.0 }
 0x1e1   :  { %v882_v30 = vpop.f32.mrf.mxu0 }
 0x1e2   :  { %v933_v32 = vmax.f32 %v891_v29, 0.0  ;;  %v883_v33 = vadd.f32 %v882_v30, %v278_v27 }
 0x1e3   :  { %v1298_v34 = vpop.f32.mrf.mxu1 }
 0x1e4   :  { %v1131_v37 = vpack.c.bf16 %v933_v32, %v932_v31  ;;  %v931_v38 = vmax.f32 %v883_v33, 0.0  ;;  %v904_v43 = vadd.f32 %v1298_v34, %v299_v35 }
 0x1e5   :  { %v895_v39 = vpop.f32.mrf.mxu1 }
 0x1e6   :  { %1155 = vst [vmem:[#allocation10 + $0x18] sm:$0xff] %v1131_v37   ;;  %v1126_v42 = vpack.c.bf16 %v931_v38, %v930_v36  ;;  %v896_v46 = vadd.f32 %v895_v39, %v291_v40  ;;  %v936_v49 = vmax.f32 %v904_v43, 0.0 }
 0x1e7   :  { %v1299_v44 = vpop.f32.mrf.mxu1 }
 0x1e8   :  { %1154 = vst [vmem:[#allocation10 + $0x10] sm:$0xff] %v1126_v42   ;;  %v907_v47 = vadd.f32 %v1299_v44, %v302_v41  ;;  %v934_v54 = vmax.f32 %v896_v46, 0.0 }
 0x1e9   :  { %v898_v48 = vpop.f32.mrf.mxu1 }
 0x1ea   :  { %v937_v50 = vmax.f32 %v907_v47, 0.0  ;;  %v899_v51 = vadd.f32 %v898_v48, %v294_v45 }
 0x1eb   :  { %v1302_v52 = vpop.f32.mrf.mxu1 }
 0x1ec   :  { %v1141_v55 = vpack.c.bf16 %v937_v50, %v936_v49  ;;  %v935_v56 = vmax.f32 %v899_v51, 0.0  ;;  %v920_v2 = vadd.f32 %v1302_v52, %v315_v53 }
 0x1ed   :  { %v911_v57 = vpop.f32.mrf.mxu1 }
 0x1ee   :  { %1157 = vst [vmem:[#allocation10 + $0x28] sm:$0xff] %v1141_v55   ;;  %v1136_v60 = vpack.c.bf16 %v935_v56, %v934_v54  ;;  %v912_v5 = vadd.f32 %v911_v57, %v307_v58  ;;  %v940_v7 = vmax.f32 %v920_v2, 0.0 }
 0x1ef   :  { %v1303_v3 = vpop.f32.mrf.mxu1 }
 0x1f0   :  { %1156 = vst [vmem:[#allocation10 + $0x20] sm:$0xff] %v1136_v60   ;;  %v923_v61 = vadd.f32 %v1303_v3, %v318_v59  ;;  %v938_v62 = vmax.f32 %v912_v5, 0.0 }
 0x1f1   :  { %v914_v6 = vpop.f32.mrf.mxu1 }
 0x1f2   :  { %v941_v8 = vmax.f32 %v923_v61, 0.0  ;;  %v915_v9 = vadd.f32 %v914_v6, %v310_v4 }
 0x1f4   :  { %v1151_v10 = vpack.c.bf16 %v941_v8, %v940_v7  ;;  %v939_v11 = vmax.f32 %v915_v9, 0.0 }
 0x1f6   :  { %1159 = vst [vmem:[#allocation10 + $0x38] sm:$0xff] %v1151_v10   ;;  %v1146_v63 = vpack.c.bf16 %v939_v11, %v938_v62 }
 0x1f8   :  { %1158 = vst [vmem:[#allocation10 + $0x30] sm:$0xff] %v1146_v63  }
 0x1f9   :  { %1440 = shalt.err (!%p1437_p5)
}
 0x1fa   :  { %1033 = dma.vmem_to_hbm [thread:$0]  %s1028_s8, 1024, %s1659_s7, [#allocation6], %s1457_s29, %s1457_s29, %s1458_s30  }
 0x1fb   :  { %1453 = dma.done.wait [#allocation6], 1024  }
 0x1fc   :  { %1454 = vsyncadd [#allocation6], 4294966272 }
 0x1fd   :  { %1037 = vsyncpa [#allocation5], 1 }
 0x1fe   :  { %1038 = vsyncpa [#allocation8], 1 }
 0x1ff   :  { %1039 = vsyncpa [#allocation6], 1 }

</bundles_post_ra>
